<compile_context>
chip_gen: v7x
topology: tpu7x:2x2x1
jax: 0.10.0
libtpu: 0.0.40
codegen_flags: <defaults>
</compile_context>

<pallas_src>
import functools

import jax
import jax.numpy as jnp
from jax.experimental import pallas as pl
from jax.experimental.pallas import tpu as pltpu


def _round_up(n, m):
    return ((n + m - 1) // m) * m


def _rnn_kernel(emb_ref, gamma_ref, beta_ref, wih_ref, bias_ref,
                whh_ref, wout_ref, bout_ref, out_ref, h_ref, u_ref,
                *, chunk_len, batch_pad, seq_len, emb_dim,
                mask_lanes, mask_tail, unroll):
    """One grid step == one chunk of `chunk_len` timesteps.

    emb_ref : (chunk_len*batch_pad, emb_pad)  this chunk of embedded tokens
    gamma/beta : (1, emb_pad)                 LayerNorm affine (pad lanes = 0)
    wih_ref : (emb_pad, hid_pad)              x @ W layout, zero padded
    bias_ref: (1, hid_pad)                    b_ih + b_hh folded, zero padded
    whh_ref : (hid_pad, hid_pad)              zero padded
    wout_ref: (hid_pad, out_pad)              zero padded
    bout_ref: (1, out_pad)
    out_ref : (batch_pad, out_pad)            written on the last chunk only
    h_ref   : (batch_pad, hid_pad)            persistent hidden state (scratch)
    u_ref   : (chunk_len*batch_pad, hid_pad)  per-chunk U = LN(x)@W_ih + b
    """
    chunk = pl.program_id(0)

    @pl.when(chunk == 0)
    def _():
        h_ref[...] = jnp.zeros_like(h_ref)

    # --- Fused LayerNorm (two-pass, f32) + hoisted input projection --------
    x = emb_ref[...]                                      # (C*Bp, Ep)
    inv_e = 1.0 / emb_dim
    mean = jnp.sum(x, axis=-1, keepdims=True) * inv_e     # pad lanes are zero
    d = x - mean
    if mask_lanes:
        # Padded lanes of d are (-mean) != 0; mask them out of the variance.
        lane = jax.lax.broadcasted_iota(jnp.int32, (1, x.shape[-1]), 1)
        dm = jnp.where(lane < emb_dim, d, 0.0)
    else:
        dm = d
    var = jnp.sum(dm * dm, axis=-1, keepdims=True) * inv_e
    x_norm = d * jax.lax.rsqrt(var + 1e-5) * gamma_ref[...] + beta_ref[...]

    # Input projection for all timesteps of this chunk at once (MXU), biases
    # folded in; stored to VMEM scratch so the serial loop only does h@W_hh.
    u_ref[...] = (jnp.dot(x_norm, wih_ref[...],
                          preferred_element_type=jnp.float32)
                  + bias_ref[...])

    whh = whh_ref[...]

    # --- Serial critical path: one (Bp,Hp)@(Hp,Hp) matmul + tanh per step --
    def step(t, h):
        start = pl.multiple_of(t * batch_pad, batch_pad)  # aligned sublane load
        u_t = u_ref[pl.ds(start, batch_pad), :]
        h_new = jnp.tanh(u_t + jnp.dot(h, whh,
                                       preferred_element_type=jnp.float32))
        if mask_tail:
            # Padded tail timesteps (token 0 filler) must not update h.
            t_global = chunk * chunk_len + t
            h_new = jnp.where(t_global < seq_len, h_new, h)
        return h_new

    h = jax.lax.fori_loop(0, chunk_len, step, h_ref[...], unroll=unroll)
    h_ref[...] = h

    # --- Output head on the last chunk -------------------------------------
    @pl.when(chunk == pl.num_programs(0) - 1)
    def _():
        out_ref[...] = (jnp.dot(h, wout_ref[...],
                                preferred_element_type=jnp.float32)
                        + bout_ref[...]).astype(out_ref.dtype)


@functools.partial(jax.jit, static_argnames=("target_rows",))
def rnn_from_scratch(x_tokens, params, *, target_rows=512):
    """x_tokens: int32 (batch, seq_len). Returns (batch, output_dim) float32."""
    emb_table = params["embedding"]          # (vocab, emb), row 0 == 0 (padding_idx)
    gamma, beta = params["ln_gamma"], params["ln_beta"]
    w_ih, b_ih = params["w_ih"], params["b_ih"]      # (emb, hidden), (hidden,)
    w_hh, b_hh = params["w_hh"], params["b_hh"]      # (hidden, hidden), (hidden,)
    w_out, b_out = params["w_out"], params["b_out"]  # (hidden, out), (out,)

    batch, seq_len = x_tokens.shape
    emb_dim = emb_table.shape[1]
    hidden_dim = w_hh.shape[0]
    out_dim = w_out.shape[1]

    if seq_len == 0:
        # h stays zero, so out = 0 @ W_out + b_out.
        return jnp.broadcast_to(b_out.astype(jnp.float32), (batch, out_dim))

    batch_p = _round_up(batch, 8)            # sublane alignment
    emb_p = _round_up(emb_dim, 128)          # lane alignment
    hid_p = _round_up(hidden_dim, 128)
    out_p = _round_up(out_dim, 128)

    # Timestep chunking: ~target_rows slab rows per grid step.
    chunk_len = max(1, min(seq_len, target_rows // batch_p))
    num_chunks = (seq_len + chunk_len - 1) // chunk_len
    seq_pad = num_chunks * chunk_len
    mask_tail = seq_pad != seq_len

    # Pad the (small) embedding table columns and the token ids (token 0 is
    # the zero padding row) instead of padding the big embedded slab in HBM.
    emb_table_p = jnp.pad(emb_table, ((0, 0), (0, emb_p - emb_dim)))
    x_pad = jnp.pad(x_tokens, ((0, batch_p - batch), (0, seq_pad - seq_len)))

    # Embedding gather with the (seq, batch) transpose folded into it.
    embedded = jnp.take(emb_table_p, x_pad.T, axis=0)      # (Sp, Bp, Ep)
    embedded = embedded.reshape(seq_pad * batch_p, emb_p)  # contiguous view

    gamma_p = jnp.pad(gamma, (0, emb_p - emb_dim)).reshape(1, emb_p)
    beta_p = jnp.pad(beta, (0, emb_p - emb_dim)).reshape(1, emb_p)
    w_ih_p = jnp.pad(w_ih, ((0, emb_p - emb_dim), (0, hid_p - hidden_dim)))
    bias_p = jnp.pad(b_ih + b_hh, (0, hid_p - hidden_dim)).reshape(1, hid_p)
    w_hh_p = jnp.pad(w_hh, ((0, hid_p - hidden_dim), (0, hid_p - hidden_dim)))
    w_out_p = jnp.pad(w_out, ((0, hid_p - hidden_dim), (0, out_p - out_dim)))
    b_out_p = jnp.pad(b_out, (0, out_p - out_dim)).reshape(1, out_p)

    kernel = functools.partial(
        _rnn_kernel,
        chunk_len=chunk_len, batch_pad=batch_p, seq_len=seq_len,
        emb_dim=emb_dim, mask_lanes=(emb_p != emb_dim),
        mask_tail=mask_tail, unroll=min(chunk_len, 8))

    def resident(shape):
        # Same block index on every grid step: DMA'd once, stays in VMEM.
        return pl.BlockSpec(shape, lambda i: (0,) * len(shape))

    out = pl.pallas_call(
        kernel,
        out_shape=jax.ShapeDtypeStruct((batch_p, out_p), jnp.float32),
        grid=(num_chunks,),
        in_specs=[
            # Streamed slab: chunk i -> rows [i*chunk_len*Bp, (i+1)*chunk_len*Bp)
            pl.BlockSpec((chunk_len * batch_p, emb_p), lambda i: (i, 0)),
            resident((1, emb_p)),                    # gamma
            resident((1, emb_p)),                    # beta
            resident((emb_p, hid_p)),                # w_ih
            resident((1, hid_p)),                    # b_ih + b_hh
            resident((hid_p, hid_p)),                # w_hh
            resident((hid_p, out_p)),                # w_out
            resident((1, out_p)),                    # b_out
        ],
        out_specs=resident((batch_p, out_p)),
        scratch_shapes=[
            pltpu.VMEM((batch_p, hid_p), jnp.float32),              # h carry
            pltpu.VMEM((chunk_len * batch_p, hid_p), jnp.float32),  # U chunk
        ],
        compiler_params=pltpu.CompilerParams(
            dimension_semantics=("arbitrary",)),     # serial recurrence axis
    )(embedded, gamma_p, beta_p, w_ih_p, bias_p, w_hh_p, w_out_p, b_out_p)

    return out[:batch, :out_dim]


def init_params(key, vocab_size, embedding_dim, hidden_dim, output_dim):
    ks = jax.random.split(key, 7)
    scale = 0.1
    embedding = scale * jax.random.normal(ks[0], (vocab_size, embedding_dim), jnp.float32)
    embedding = embedding.at[0].set(0.0)  # padding_idx=0
    return {
        "embedding": embedding,
        "ln_gamma": jnp.ones((embedding_dim,), jnp.float32),
        "ln_beta": jnp.zeros((embedding_dim,), jnp.float32),
        "w_ih": scale * jax.random.normal(ks[1], (embedding_dim, hidden_dim), jnp.float32),
        "b_ih": scale * jax.random.normal(ks[2], (hidden_dim,), jnp.float32),
        "w_hh": scale * jax.random.normal(ks[3], (hidden_dim, hidden_dim), jnp.float32),
        "b_hh": scale * jax.random.normal(ks[4], (hidden_dim,), jnp.float32),
        "w_out": scale * jax.random.normal(ks[5], (hidden_dim, output_dim), jnp.float32),
        "b_out": scale * jax.random.normal(ks[6], (output_dim,), jnp.float32),
    }


def _reference(x_tokens, params):
    """Pure-JAX reference mirroring the PyTorch forward."""
    emb = jnp.take(params["embedding"], x_tokens, axis=0)        # (B, S, E)
    mean = jnp.mean(emb, axis=-1, keepdims=True)
    var = jnp.mean((emb - mean) ** 2, axis=-1, keepdims=True)
    emb = (emb - mean) / jnp.sqrt(var + 1e-5)
    emb = emb * params["ln_gamma"] + params["ln_beta"]
    B, S, _ = emb.shape
    h = jnp.zeros((B, params["w_hh"].shape[0]), jnp.float32)
    for t in range(S):
        x_t = emb[:, t, :]
        h = jnp.tanh(x_t @ params["w_ih"] + params["b_ih"]
                     + h @ params["w_hh"] + params["b_hh"])
    return h @ params["w_out"] + params["b_out"]


if __name__ == "__main__":
    vocab_size, embedding_dim, hidden_dim, output_dim = 50, 32, 32, 16
    batch, seq_len = 4, 8

    key = jax.random.PRNGKey(0)
    k_tok, k_par = jax.random.split(key)
    params = init_params(k_par, vocab_size, embedding_dim, hidden_dim, output_dim)
    x = jax.random.randint(k_tok, (batch, seq_len), 0, vocab_size, dtype=jnp.int32)

    ref = _reference(x, params)

    # Single-chunk path (chunk covers the whole sequence).
    out = jax.block_until_ready(rnn_from_scratch(x, params))
    assert out.shape == (batch, output_dim)
    assert jnp.allclose(out, ref, atol=1e-4, rtol=1e-4), (out, ref)

    # Multi-chunk streaming path with a padded tail (chunk_len=3 -> 3 chunks,
    # seq padded 8 -> 9, tail step masked).
    out2 = jax.block_until_ready(rnn_from_scratch(x, params, target_rows=24))
    assert jnp.allclose(out2, ref, atol=1e-4, rtol=1e-4), (out2, ref)

    print("KERNEL_OK")
</pallas_src>

<mosaic_0001>
module attributes {stable_mosaic.version = 11 : i64} {
  func.func @_rnn_kernel(%arg0: i32, %arg1: memref<64x128xf32, #tpu.memory_space<vmem>>, %arg2: memref<1x128xf32, #tpu.memory_space<vmem>>, %arg3: memref<1x128xf32, #tpu.memory_space<vmem>>, %arg4: memref<128x128xf32, #tpu.memory_space<vmem>>, %arg5: memref<1x128xf32, #tpu.memory_space<vmem>>, %arg6: memref<128x128xf32, #tpu.memory_space<vmem>>, %arg7: memref<128x128xf32, #tpu.memory_space<vmem>>, %arg8: memref<1x128xf32, #tpu.memory_space<vmem>>, %arg9: memref<8x128xf32, #tpu.memory_space<vmem>>, %arg10: memref<8x128xf32, #tpu.memory_space<vmem>>, %arg11: memref<64x128xf32, #tpu.memory_space<vmem>>) attributes {dimension_semantics = [#tpu.dimension_semantics<arbitrary>], iteration_bounds = array<i64: 1>, scalar_prefetch = 0 : i64, scratch_operands = 2 : i64, tpu.core_type = #tpu.core_type<tc>, window_params = [{transform_indices = @transform_0, window_bounds = array<i64: 64, 128>}, {pipeline_mode = #tpu.pipeline_mode<synchronous>, transform_indices = @transform_1, window_bounds = array<i64: 1, 128>}, {pipeline_mode = #tpu.pipeline_mode<synchronous>, transform_indices = @transform_2, window_bounds = array<i64: 1, 128>}, {pipeline_mode = #tpu.pipeline_mode<synchronous>, transform_indices = @transform_3, window_bounds = array<i64: 128, 128>}, {pipeline_mode = #tpu.pipeline_mode<synchronous>, transform_indices = @transform_4, window_bounds = array<i64: 1, 128>}, {pipeline_mode = #tpu.pipeline_mode<synchronous>, transform_indices = @transform_5, window_bounds = array<i64: 128, 128>}, {pipeline_mode = #tpu.pipeline_mode<synchronous>, transform_indices = @transform_6, window_bounds = array<i64: 128, 128>}, {pipeline_mode = #tpu.pipeline_mode<synchronous>, transform_indices = @transform_7, window_bounds = array<i64: 1, 128>}, {pipeline_mode = #tpu.pipeline_mode<synchronous>, transform_indices = @transform_8, window_bounds = array<i64: 8, 128>}]} {
    %c0_i32 = arith.constant 0 : i32
    %0 = arith.cmpi eq, %arg0, %c0_i32 : i32
    %1 = arith.extui %0 : i1 to i32
    %c0_i32_0 = arith.constant 0 : i32
    %2 = arith.cmpi ne, %1, %c0_i32_0 : i32
    scf.if %2 {
      %cst_51 = arith.constant 0.000000e+00 : f32
      %101 = vector.broadcast %cst_51 : f32 to vector<8x128xf32>
      %c0_52 = arith.constant 0 : index
      %c0_53 = arith.constant 0 : index
      %102 = vector.load %arg10[%c0_52, %c0_53] : memref<8x128xf32, #tpu.memory_space<vmem>>, vector<8x128xf32>
      tpu.vector_store %arg10[%c0_52, %c0_53], %101 {strides = array<i32>} : memref<8x128xf32, #tpu.memory_space<vmem>>, vector<8x128xf32>,
    } else {
    }
    %c0 = arith.constant 0 : index
    %c0_1 = arith.constant 0 : index
    %3 = vector.load %arg1[%c0, %c0_1] : memref<64x128xf32, #tpu.memory_space<vmem>>, vector<64x128xf32>
    %cst = arith.constant dense<0.000000e+00> : vector<64xf32>
    %4 = vector.multi_reduction <add>, %3, %cst [1] : vector<64x128xf32> to vector<64xf32>
    %5 = vector.shape_cast %4 : vector<64xf32> to vector<64x1xf32>
    %cst_2 = arith.constant 3.125000e-02 : f32
    %6 = vector.broadcast %cst_2 : f32 to vector<64x1xf32>
    %7 = arith.mulf %5, %6 : vector<64x1xf32>
    %8 = vector.broadcast %7 : vector<64x1xf32> to vector<64x128xf32>
    %9 = arith.subf %3, %8 : vector<64x128xf32>
    %10 = tpu.iota {dimensions = array<i32: 1>} : vector<1x128xi32>
    %c32_i32 = arith.constant 32 : i32
    %11 = vector.broadcast %c32_i32 : i32 to vector<1x128xi32>
    %12 = arith.cmpi slt, %10, %11 : vector<1x128xi32>
    %cst_3 = arith.constant 0.000000e+00 : f32
    %13 = vector.shape_cast %12 : vector<1x128xi1> to vector<1x128xi1>
    %14 = vector.broadcast %13 : vector<1x128xi1> to vector<64x128xi1>
    %15 = vector.broadcast %cst_3 : f32 to vector<64x128xf32>
    %16 = arith.select %14, %9, %15 : vector<64x128xi1>, vector<64x128xf32>
    %17 = arith.mulf %16, %16 : vector<64x128xf32>
    %cst_4 = arith.constant dense<0.000000e+00> : vector<64xf32>
    %18 = vector.multi_reduction <add>, %17, %cst_4 [1] : vector<64x128xf32> to vector<64xf32>
    %19 = vector.shape_cast %18 : vector<64xf32> to vector<64x1xf32>
    %cst_5 = arith.constant 3.125000e-02 : f32
    %20 = vector.broadcast %cst_5 : f32 to vector<64x1xf32>
    %21 = arith.mulf %19, %20 : vector<64x1xf32>
    %cst_6 = arith.constant 9.99999974E-6 : f32
    %22 = vector.broadcast %cst_6 : f32 to vector<64x1xf32>
    %23 = arith.addf %21, %22 : vector<64x1xf32>
    %24 = math.rsqrt %23 : vector<64x1xf32>
    %25 = vector.broadcast %24 : vector<64x1xf32> to vector<64x128xf32>
    %26 = arith.mulf %9, %25 : vector<64x128xf32>
    %c0_7 = arith.constant 0 : index
    %c0_8 = arith.constant 0 : index
    %27 = vector.load %arg2[%c0_7, %c0_8] : memref<1x128xf32, #tpu.memory_space<vmem>>, vector<1x128xf32>
    %28 = vector.broadcast %27 : vector<1x128xf32> to vector<64x128xf32>
    %29 = arith.mulf %26, %28 : vector<64x128xf32>
    %c0_9 = arith.constant 0 : index
    %c0_10 = arith.constant 0 : index
    %30 = vector.load %arg3[%c0_9, %c0_10] : memref<1x128xf32, #tpu.memory_space<vmem>>, vector<1x128xf32>
    %31 = vector.broadcast %30 : vector<1x128xf32> to vector<64x128xf32>
    %32 = arith.addf %29, %31 : vector<64x128xf32>
    %c0_11 = arith.constant 0 : index
    %c0_12 = arith.constant 0 : index
    %33 = vector.load %arg4[%c0_11, %c0_12] : memref<128x128xf32, #tpu.memory_space<vmem>>, vector<128x128xf32>
    %cst_13 = arith.constant dense<0.000000e+00> : vector<64x128xf32>
    %34 = tpu.matmul %32, %33, %cst_13 {dimension_numbers = #tpu.dot_dimension_numbers<[1], [0], [0], [1], [0, 0, 1, 1], [], []>} : vector<64x128xf32>, vector<128x128xf32>, vector<64x128xf32> -> vector<64x128xf32>
    %c0_14 = arith.constant 0 : index
    %c0_15 = arith.constant 0 : index
    %35 = vector.load %arg5[%c0_14, %c0_15] : memref<1x128xf32, #tpu.memory_space<vmem>>, vector<1x128xf32>
    %36 = vector.broadcast %35 : vector<1x128xf32> to vector<64x128xf32>
    %37 = arith.addf %34, %36 : vector<64x128xf32>
    %c0_16 = arith.constant 0 : index
    %c0_17 = arith.constant 0 : index
    %38 = vector.load %arg11[%c0_16, %c0_17] : memref<64x128xf32, #tpu.memory_space<vmem>>, vector<64x128xf32>
    tpu.vector_store %arg11[%c0_16, %c0_17], %37 {strides = array<i32>} : memref<64x128xf32, #tpu.memory_space<vmem>>, vector<64x128xf32>,
    %c0_18 = arith.constant 0 : index
    %c0_19 = arith.constant 0 : index
    %39 = vector.load %arg6[%c0_18, %c0_19] : memref<128x128xf32, #tpu.memory_space<vmem>>, vector<128x128xf32>
    %c0_20 = arith.constant 0 : index
    %c0_21 = arith.constant 0 : index
    %40 = vector.load %arg10[%c0_20, %c0_21] : memref<8x128xf32, #tpu.memory_space<vmem>>, vector<8x128xf32>
    %c0_i32_22 = arith.constant 0 : i32
    %c8_i32 = arith.constant 8 : i32
    %41 = arith.muli %c0_i32_22, %c8_i32 : i32
    %42 = tpu.assume_multiple %41, 8 : i32
    %43 = arith.index_cast %42 : i32 to index
    %c0_23 = arith.constant 0 : index
    %44 = vector.load %arg11[%43, %c0_23] : memref<64x128xf32, #tpu.memory_space<vmem>>, vector<8x128xf32>
    %cst_24 = arith.constant dense<0.000000e+00> : vector<8x128xf32>
    %45 = tpu.matmul %40, %39, %cst_24 {dimension_numbers = #tpu.dot_dimension_numbers<[1], [0], [0], [1], [0, 0, 1, 1], [], []>} : vector<8x128xf32>, vector<128x128xf32>, vector<8x128xf32> -> vector<8x128xf32>
    %46 = arith.addf %44, %45 : vector<8x128xf32>
    %47 = math.tanh %46 : vector<8x128xf32>
    %c1_i32 = arith.constant 1 : i32
    %c8_i32_25 = arith.constant 8 : i32
    %48 = arith.muli %c1_i32, %c8_i32_25 : i32
    %49 = tpu.assume_multiple %48, 8 : i32
    %50 = arith.index_cast %49 : i32 to index
    %c0_26 = arith.constant 0 : index
    %51 = vector.load %arg11[%50, %c0_26] : memref<64x128xf32, #tpu.memory_space<vmem>>, vector<8x128xf32>
    %cst_27 = arith.constant dense<0.000000e+00> : vector<8x128xf32>
    %52 = tpu.matmul %47, %39, %cst_27 {dimension_numbers = #tpu.dot_dimension_numbers<[1], [0], [0], [1], [0, 0, 1, 1], [], []>} : vector<8x128xf32>, vector<128x128xf32>, vector<8x128xf32> -> vector<8x128xf32>
    %53 = arith.addf %51, %52 : vector<8x128xf32>
    %54 = math.tanh %53 : vector<8x128xf32>
    %c2_i32 = arith.constant 2 : i32
    %c8_i32_28 = arith.constant 8 : i32
    %55 = arith.muli %c2_i32, %c8_i32_28 : i32
    %56 = tpu.assume_multiple %55, 8 : i32
    %57 = arith.index_cast %56 : i32 to index
    %c0_29 = arith.constant 0 : index
    %58 = vector.load %arg11[%57, %c0_29] : memref<64x128xf32, #tpu.memory_space<vmem>>, vector<8x128xf32>
    %cst_30 = arith.constant dense<0.000000e+00> : vector<8x128xf32>
    %59 = tpu.matmul %54, %39, %cst_30 {dimension_numbers = #tpu.dot_dimension_numbers<[1], [0], [0], [1], [0, 0, 1, 1], [], []>} : vector<8x128xf32>, vector<128x128xf32>, vector<8x128xf32> -> vector<8x128xf32>
    %60 = arith.addf %58, %59 : vector<8x128xf32>
    %61 = math.tanh %60 : vector<8x128xf32>
    %c3_i32 = arith.constant 3 : i32
    %c8_i32_31 = arith.constant 8 : i32
    %62 = arith.muli %c3_i32, %c8_i32_31 : i32
    %63 = tpu.assume_multiple %62, 8 : i32
    %64 = arith.index_cast %63 : i32 to index
    %c0_32 = arith.constant 0 : index
    %65 = vector.load %arg11[%64, %c0_32] : memref<64x128xf32, #tpu.memory_space<vmem>>, vector<8x128xf32>
    %cst_33 = arith.constant dense<0.000000e+00> : vector<8x128xf32>
    %66 = tpu.matmul %61, %39, %cst_33 {dimension_numbers = #tpu.dot_dimension_numbers<[1], [0], [0], [1], [0, 0, 1, 1], [], []>} : vector<8x128xf32>, vector<128x128xf32>, vector<8x128xf32> -> vector<8x128xf32>
    %67 = arith.addf %65, %66 : vector<8x128xf32>
    %68 = math.tanh %67 : vector<8x128xf32>
    %c4_i32 = arith.constant 4 : i32
    %c8_i32_34 = arith.constant 8 : i32
    %69 = arith.muli %c4_i32, %c8_i32_34 : i32
    %70 = tpu.assume_multiple %69, 8 : i32
    %71 = arith.index_cast %70 : i32 to index
    %c0_35 = arith.constant 0 : index
    %72 = vector.load %arg11[%71, %c0_35] : memref<64x128xf32, #tpu.memory_space<vmem>>, vector<8x128xf32>
    %cst_36 = arith.constant dense<0.000000e+00> : vector<8x128xf32>
    %73 = tpu.matmul %68, %39, %cst_36 {dimension_numbers = #tpu.dot_dimension_numbers<[1], [0], [0], [1], [0, 0, 1, 1], [], []>} : vector<8x128xf32>, vector<128x128xf32>, vector<8x128xf32> -> vector<8x128xf32>
    %74 = arith.addf %72, %73 : vector<8x128xf32>
    %75 = math.tanh %74 : vector<8x128xf32>
    %c5_i32 = arith.constant 5 : i32
    %c8_i32_37 = arith.constant 8 : i32
    %76 = arith.muli %c5_i32, %c8_i32_37 : i32
    %77 = tpu.assume_multiple %76, 8 : i32
    %78 = arith.index_cast %77 : i32 to index
    %c0_38 = arith.constant 0 : index
    %79 = vector.load %arg11[%78, %c0_38] : memref<64x128xf32, #tpu.memory_space<vmem>>, vector<8x128xf32>
    %cst_39 = arith.constant dense<0.000000e+00> : vector<8x128xf32>
    %80 = tpu.matmul %75, %39, %cst_39 {dimension_numbers = #tpu.dot_dimension_numbers<[1], [0], [0], [1], [0, 0, 1, 1], [], []>} : vector<8x128xf32>, vector<128x128xf32>, vector<8x128xf32> -> vector<8x128xf32>
    %81 = arith.addf %79, %80 : vector<8x128xf32>
    %82 = math.tanh %81 : vector<8x128xf32>
    %c6_i32 = arith.constant 6 : i32
    %c8_i32_40 = arith.constant 8 : i32
    %83 = arith.muli %c6_i32, %c8_i32_40 : i32
    %84 = tpu.assume_multiple %83, 8 : i32
    %85 = arith.index_cast %84 : i32 to index
    %c0_41 = arith.constant 0 : index
    %86 = vector.load %arg11[%85, %c0_41] : memref<64x128xf32, #tpu.memory_space<vmem>>, vector<8x128xf32>
    %cst_42 = arith.constant dense<0.000000e+00> : vector<8x128xf32>
    %87 = tpu.matmul %82, %39, %cst_42 {dimension_numbers = #tpu.dot_dimension_numbers<[1], [0], [0], [1], [0, 0, 1, 1], [], []>} : vector<8x128xf32>, vector<128x128xf32>, vector<8x128xf32> -> vector<8x128xf32>
    %88 = arith.addf %86, %87 : vector<8x128xf32>
    %89 = math.tanh %88 : vector<8x128xf32>
    %c7_i32 = arith.constant 7 : i32
    %c8_i32_43 = arith.constant 8 : i32
    %90 = arith.muli %c7_i32, %c8_i32_43 : i32
    %91 = tpu.assume_multiple %90, 8 : i32
    %92 = arith.index_cast %91 : i32 to index
    %c0_44 = arith.constant 0 : index
    %93 = vector.load %arg11[%92, %c0_44] : memref<64x128xf32, #tpu.memory_space<vmem>>, vector<8x128xf32>
    %cst_45 = arith.constant dense<0.000000e+00> : vector<8x128xf32>
    %94 = tpu.matmul %89, %39, %cst_45 {dimension_numbers = #tpu.dot_dimension_numbers<[1], [0], [0], [1], [0, 0, 1, 1], [], []>} : vector<8x128xf32>, vector<128x128xf32>, vector<8x128xf32> -> vector<8x128xf32>
    %95 = arith.addf %93, %94 : vector<8x128xf32>
    %96 = math.tanh %95 : vector<8x128xf32>
    %c8_i32_46 = arith.constant 8 : i32
    %c0_47 = arith.constant 0 : index
    %c0_48 = arith.constant 0 : index
    %97 = vector.load %arg10[%c0_47, %c0_48] : memref<8x128xf32, #tpu.memory_space<vmem>>, vector<8x128xf32>
    tpu.vector_store %arg10[%c0_47, %c0_48], %96 {strides = array<i32>} : memref<8x128xf32, #tpu.memory_space<vmem>>, vector<8x128xf32>,
    %c0_i32_49 = arith.constant 0 : i32
    %98 = arith.cmpi eq, %arg0, %c0_i32_49 : i32
    %99 = arith.extui %98 : i1 to i32
    %c0_i32_50 = arith.constant 0 : i32
    %100 = arith.cmpi ne, %99, %c0_i32_50 : i32
    scf.if %100 {
      %c0_51 = arith.constant 0 : index
      %c0_52 = arith.constant 0 : index
      %101 = vector.load %arg7[%c0_51, %c0_52] : memref<128x128xf32, #tpu.memory_space<vmem>>, vector<128x128xf32>
      %cst_53 = arith.constant dense<0.000000e+00> : vector<8x128xf32>
      %102 = tpu.matmul %96, %101, %cst_53 {dimension_numbers = #tpu.dot_dimension_numbers<[1], [0], [0], [1], [0, 0, 1, 1], [], []>} : vector<8x128xf32>, vector<128x128xf32>, vector<8x128xf32> -> vector<8x128xf32>
      %c0_54 = arith.constant 0 : index
      %c0_55 = arith.constant 0 : index
      %103 = vector.load %arg8[%c0_54, %c0_55] : memref<1x128xf32, #tpu.memory_space<vmem>>, vector<1x128xf32>
      %104 = vector.broadcast %103 : vector<1x128xf32> to vector<8x128xf32>
      %105 = arith.addf %102, %104 : vector<8x128xf32>
      %c0_56 = arith.constant 0 : index
      %c0_57 = arith.constant 0 : index
      %106 = vector.load %arg9[%c0_56, %c0_57] : memref<8x128xf32, #tpu.memory_space<vmem>>, vector<8x128xf32>
      tpu.vector_store %arg9[%c0_56, %c0_57], %105 {strides = array<i32>} : memref<8x128xf32, #tpu.memory_space<vmem>>, vector<8x128xf32>,
    } else {
    }
    return
  }
  func.func @transform_0(%arg0: i32) -> (i32, i32) {
    %c0_i32 = arith.constant 0 : i32
    %c0_i32_0 = arith.constant 0 : i32
    return %arg0, %c0_i32 : i32, i32
  }
  func.func @transform_1(%arg0: i32) -> (i32, i32) {
    %c0_i32 = arith.constant 0 : i32
    %c0_i32_0 = arith.constant 0 : i32
    %c0_i32_1 = arith.constant 0 : i32
    return %c0_i32, %c0_i32_0 : i32, i32
  }
  func.func @transform_2(%arg0: i32) -> (i32, i32) {
    %c0_i32 = arith.constant 0 : i32
    %c0_i32_0 = arith.constant 0 : i32
    %c0_i32_1 = arith.constant 0 : i32
    return %c0_i32, %c0_i32_0 : i32, i32
  }
  func.func @transform_3(%arg0: i32) -> (i32, i32) {
    %c0_i32 = arith.constant 0 : i32
    %c0_i32_0 = arith.constant 0 : i32
    %c0_i32_1 = arith.constant 0 : i32
    return %c0_i32, %c0_i32_0 : i32, i32
  }
  func.func @transform_4(%arg0: i32) -> (i32, i32) {
    %c0_i32 = arith.constant 0 : i32
    %c0_i32_0 = arith.constant 0 : i32
    %c0_i32_1 = arith.constant 0 : i32
    return %c0_i32, %c0_i32_0 : i32, i32
  }
  func.func @transform_5(%arg0: i32) -> (i32, i32) {
    %c0_i32 = arith.constant 0 : i32
    %c0_i32_0 = arith.constant 0 : i32
    %c0_i32_1 = arith.constant 0 : i32
    return %c0_i32, %c0_i32_0 : i32, i32
  }
  func.func @transform_6(%arg0: i32) -> (i32, i32) {
    %c0_i32 = arith.constant 0 : i32
    %c0_i32_0 = arith.constant 0 : i32
    %c0_i32_1 = arith.constant 0 : i32
    return %c0_i32, %c0_i32_0 : i32, i32
  }
  func.func @transform_7(%arg0: i32) -> (i32, i32) {
    %c0_i32 = arith.constant 0 : i32
    %c0_i32_0 = arith.constant 0 : i32
    %c0_i32_1 = arith.constant 0 : i32
    return %c0_i32, %c0_i32_0 : i32, i32
  }
  func.func @transform_8(%arg0: i32) -> (i32, i32) {
    %c0_i32 = arith.constant 0 : i32
    %c0_i32_0 = arith.constant 0 : i32
    %c0_i32_1 = arith.constant 0 : i32
    return %c0_i32, %c0_i32_0 : i32, i32
  }
}

</mosaic_0001>

<bundles_post_ra>
// kernel: rnn_from_scratch.1
= control target key start
LH: loop header
LB: loop body
LE: loop exit
PB: predicated region body
PF: predicated region fallthrough
CT: control target
= control target key end

     0   :  { %v1842_v7 = vmov 0.0|0.0   ;;  %v74_v15 = vlaneseq  ;;  %vm1843_vm1 = vmmov 0   ;;  %s2349_s0 = inlined_call_operand.vmem [shape: f32[64,128], index: 0, kind: input, shape index: {}]   ;;  %s2350_s3 = inlined_call_operand.vmem [shape: f32[128,128], index: 3, kind: input, shape index: {}]   ;;  %s2351_s5 = inlined_call_operand.vmem [shape: f32[128,128], index: 5, kind: input, shape index: {}]   ;;  %s2352_s1 = inlined_call_operand.vmem [shape: f32[1,128], index: 1, kind: input, shape index: {}]   ;;  %s2353_s2 = inlined_call_operand.vmem [shape: f32[1,128], index: 2, kind: input, shape index: {}]   ;;  %s2354_s4 = inlined_call_operand.vmem [shape: f32[1,128], index: 4, kind: input, shape index: {}]   ;;  %s2355_s6 = inlined_call_operand.vmem [shape: f32[128,128], index: 6, kind: input, shape index: {}]   ;;  %s2356_s7 = inlined_call_operand.vmem [shape: f32[1,128], index: 7, kind: input, shape index: {}]   ;;  %s2357_s8 = inlined_call_operand.vmem [shape: f32[8,128], index: 8, kind: output, shape index: {}]  }
   0x1   :  { %v34_v0 = vld [vmem:[%s2349_s0] sm:$0xff]  ;;  %v35_v1 = vld [vmem:[%s2349_s0 + $0x8] sm:$0xff]  ;;  %v36_v2 = vld [vmem:[%s2349_s0 + $0x10] sm:$0xff]  ;;  %1591 = vmatprep.subr.bf16.mxu1 %v1842_v7 }
   0x2   :  { %42 = vadd.xlane.f32.xlu0 %v34_v0  ;;  %v38_v3 = vld [vmem:[%s2349_s0 + $0x20] sm:$0xff]  ;;  %v40_v4 = vld [vmem:[%s2349_s0 + $0x30] sm:$0xff]  ;;  %v174_v6 = vld [vmem:[%s2350_s3 + $0x8] sm:$0xff]  ;;  %v1928_v16 = vand.u32 127, %v74_v15 }
   0x3   :  { %v173_v5 = vld [vmem:[%s2350_s3] sm:$0xff]  ;;  %v310_v10 = vld [vmem:[%s2351_s5 + $0x8] sm:$0xff]  ;;  %v175_v11 = vld [vmem:[%s2350_s3 + $0x10] sm:$0xff] }
   0x4   :  { %v309_v8 = vld [vmem:[%s2351_s5] sm:$0xff]  ;;  %v1559_v9 = vpack.c.bf16 %v174_v6, %v173_v5  ;;  %v176_v12 = vld [vmem:[%s2350_s3 + $0x18] sm:$0xff]  ;;  %vm76_vm0 = vcmp.lt.s32.totalorder %v1928_v16, 32  ;;  %v1957_v37 = vld [vmem:[%s2349_s0 + $0x28] sm:$0xff] }
   0x5   :  { %v1924_v13 = vpack.c.bf16 %v310_v10, %v309_v8  ;;  %v1563_v14 = vpack.c.bf16 %v176_v12, %v175_v11  ;;  %v1946_v31 = vld [vmem:[%s2349_s0 + $0x18] sm:$0xff]  ;;  %v311_v42 = vld [vmem:[%s2351_s5 + $0x10] sm:$0xff]  ;;  %v177_v45 = vld [vmem:[%s2350_s3 + $0x20] sm:$0xff] }
   0x6   :  { %44 = vadd.xlane.f32.xlu0 %v35_v1  ;;  %1560 = vmatprep.subr.bf16.mxu0 %v1559_v9  ;;  %v312_v43 = vld [vmem:[%s2351_s5 + $0x18] sm:$0xff]  ;;  %v178_v46 = vld [vmem:[%s2350_s3 + $0x28] sm:$0xff]  ;;  %v313_v51 = vld [vmem:[%s2351_s5 + $0x20] sm:$0xff] }
   0x7   :  { %1562 = vmatpush3.bf16.msra.mxu0 %v1559_v9  ;;  %1593 = vmatpush3.bf16.msra.mxu1 %v1924_v13  ;;  %v1971_v44 = vpack.c.bf16 %v312_v43, %v311_v42  ;;  %v1982_v47 = vld [vmem:[%s2349_s0 + $0x38] sm:$0xff]  ;;  %v1567_v49 = vpack.c.bf16 %v178_v46, %v177_v45  ;;  %v314_v52 = vld [vmem:[%s2351_s5 + $0x28] sm:$0xff]  ;;  %v179_v54 = vld [vmem:[%s2350_s3 + $0x30] sm:$0xff] }
   0x8   :  { %1564 = vmatprep.subr.bf16.mxu0 %v1563_v14  ;;  %1594 = vmatprep.subr.bf16.mxu1 %v1842_v7  ;;  %v1996_v53 = vpack.c.bf16 %v314_v52, %v313_v51  ;;  %v180_v55 = vld [vmem:[%s2350_s3 + $0x38] sm:$0xff]  ;;  %v315_v57 = vld [vmem:[%s2351_s5 + $0x30] sm:$0xff]  ;;  %v181_v60 = vld [vmem:[%s2350_s3 + $0x40] sm:$0xff] }
   0x9   :  { %v1571_v56 = vpack.c.bf16 %v180_v55, %v179_v54  ;;  %v316_v58 = vld [vmem:[%s2351_s5 + $0x38] sm:$0xff]  ;;  %v182_v61 = vld [vmem:[%s2350_s3 + $0x48] sm:$0xff]  ;;  %v317_v63 = vld [vmem:[%s2351_s5 + $0x40] sm:$0xff] }
   0xa   :  { %46 = vadd.xlane.f32.xlu0 %v36_v2  ;;  %v2012_v59 = vpack.c.bf16 %v316_v58, %v315_v57  ;;  %v1575_v62 = vpack.c.bf16 %v182_v61, %v181_v60  ;;  %v319_v5 = vld [vmem:[%s2351_s5 + $0x50] sm:$0xff]  ;;  %v320_v6 = vld [vmem:[%s2351_s5 + $0x58] sm:$0xff]  ;;  %v185_v9 = vld [vmem:[%s2350_s3 + $0x60] sm:$0xff] }
   0xb   :  { %1566 = vmatpush3.bf16.msra.mxu0 %v1563_v14  ;;  %1596 = vmatpush3.bf16.msra.mxu1 %v1971_v44  ;;  %v2044_v8 = vpack.c.bf16 %v320_v6, %v319_v5  ;;  %v186_v10 = vld [vmem:[%s2350_s3 + $0x68] sm:$0xff]  ;;  %v321_v12 = vld [vmem:[%s2351_s5 + $0x60] sm:$0xff] }
   0xc   :  { %1568 = vmatprep.subr.bf16.mxu0 %v1567_v49  ;;  %1597 = vmatprep.subr.bf16.mxu1 %v1842_v7  ;;  %v1583_v11 = vpack.c.bf16 %v186_v10, %v185_v9  ;;  %v322_v14 = vld [vmem:[%s2351_s5 + $0x68] sm:$0xff]  ;;  %v2114_v51 = vld [vmem:[%s2352_s1] ss:$0 sm:$0xff] }
   0xd   :  { %v2060_v15 = vpack.c.bf16 %v322_v14, %v321_v12 }
   0xe   :  { %50 = vadd.xlane.f32.xlu0 %v38_v3 }
   0xf   :  { %1570 = vmatpush3.bf16.msra.mxu0 %v1567_v49  ;;  %1599 = vmatpush3.bf16.msra.mxu1 %v1996_v53 }
  0x10   :  { %1572 = vmatprep.subr.bf16.mxu0 %v1571_v56  ;;  %1600 = vmatprep.subr.bf16.mxu1 %v1842_v7 }
  0x12   :  { %54 = vadd.xlane.f32.xlu0 %v40_v4 }
  0x13   :  { %1574 = vmatpush3.bf16.msra.mxu0 %v1571_v56  ;;  %1602 = vmatpush3.bf16.msra.mxu1 %v2012_v59  ;;  %v2123_v56 = vld [vmem:[%s2353_s2] ss:$0 sm:$0xff] }
  0x14   :  { %1576 = vmatprep.subr.bf16.mxu0 %v1575_v62  ;;  %1603 = vmatprep.subr.bf16.mxu1 %v1842_v7 }
  0x17   :  { %1578 = vmatpush3.bf16.msra.mxu0 %v1575_v62 }
  0x8f   :  { %v43_v17 = vpop.xlane.xlu0 %42 }
  0x90   :  { %v58_v18 = vmul.f32 0.03125, %v43_v17  ;;  %v187_v17 = vld [vmem:[%s2350_s3 + $0x70] sm:$0xff] }
  0x92   :  { %v1931_v19 = vsub.f32 %v34_v0, %v58_v18  ;;  %v318_v0 = vld [vmem:[%s2351_s5 + $0x48] sm:$0xff]  ;;  %v188_v18 = vld [vmem:[%s2350_s3 + $0x78] sm:$0xff] }
  0x93   :  { %v45_v20 = vpop.xlane.xlu0 %44 }
  0x94   :  { %v59_v21 = vmul.f32 0.03125, %v45_v20  ;;  %v79_v22 = vsel %vm76_vm0, %v1931_v19, 0.0  ;;  %v1587_v20 = vpack.c.bf16 %v188_v18, %v187_v17 }
  0x95   :  { %v87_v23 = vmul.f32 %v79_v22, %v79_v22  ;;  %v324_v22 = vld [vmem:[%s2351_s5 + $0x78] sm:$0xff] }
  0x96   :  { %v1936_v24 = vsub.f32 %v35_v1, %v59_v21  ;;  %v2028_v1 = vpack.c.bf16 %v318_v0, %v317_v63  ;;  %v323_v21 = vld [vmem:[%s2351_s5 + $0x70] sm:$0xff] }
  0x97   :  { %95 = vadd.xlane.f32.xlu1 %v87_v23  ;;  %v47_v25 = vpop.xlane.xlu0 %46  ;;  %v2076_v23 = vpack.c.bf16 %v324_v22, %v323_v21 }
  0x98   :  { %v80_v26 = vsel %vm76_vm0, %v1936_v24, 0.0  ;;  %v60_v27 = vmul.f32 0.03125, %v47_v25  ;;  %1605 = vmatpush3.bf16.msra.mxu1 %v2028_v1  ;;  %v1844_v25 = vmov 0.0  }
  0x99   :  { %v88_v28 = vmul.f32 %v80_v26, %v80_v26  ;;  %1606 = vmatprep.subr.bf16.mxu1 %v1842_v7  ;;  %1276 = vmatprep.mubr.msk.f32.mxu1 %vm1843_vm1, %v1844_v25 }
  0x9a   :  { %v1941_v29 = vsub.f32 %v36_v2, %v60_v27  ;;  %v183_v2 = vld [vmem:[%s2350_s3 + $0x50] sm:$0xff] }
  0x9b   :  { %97 = vadd.xlane.f32.xlu1 %v88_v28  ;;  %v51_v30 = vpop.xlane.xlu0 %50 }
  0x9c   :  { %v62_v32 = vmul.f32 0.03125, %v51_v30  ;;  %v81_v33 = vsel %vm76_vm0, %v1941_v29, 0.0  ;;  %1608 = vmatpush3.bf16.msra.mxu1 %v2044_v8 }
  0x9d   :  { %v89_v34 = vmul.f32 %v81_v33, %v81_v33  ;;  %1609 = vmatprep.subr.bf16.mxu1 %v1842_v7 }
  0x9e   :  { %v1951_v35 = vsub.f32 %v38_v3, %v62_v32  ;;  %v184_v3 = vld [vmem:[%s2350_s3 + $0x58] sm:$0xff] }
  0x9f   :  { %48 = vadd.xlane.f32.xlu1 %v1946_v31  ;;  %99 = vadd.xlane.f32.xlu0 %v89_v34  ;;  %v55_v36 = vpop.xlane.xlu0 %54 }
  0xa0   :  { %v64_v38 = vmul.f32 0.03125, %v55_v36  ;;  %v83_v39 = vsel %vm76_vm0, %v1951_v35, 0.0  ;;  %1611 = vmatpush3.bf16.msra.mxu1 %v2060_v15 }
  0xa1   :  { %v91_v40 = vmul.f32 %v83_v39, %v83_v39  ;;  %1612 = vmatprep.subr.bf16.mxu1 %v1842_v7 }
  0xa2   :  { %v1962_v41 = vsub.f32 %v40_v4, %v64_v38  ;;  %v1579_v4 = vpack.c.bf16 %v184_v3, %v183_v2 }
  0xa3   :  { %52 = vadd.xlane.f32.xlu1 %v1957_v37  ;;  %103 = vadd.xlane.f32.xlu0 %v91_v40 }
  0xa4   :  { %v85_v48 = vsel %vm76_vm0, %v1962_v41, 0.0  ;;  %1580 = vmatprep.subr.bf16.mxu0 %v1579_v4  ;;  %1614 = vmatpush3.bf16.msra.mxu1 %v2076_v23 }
  0xa5   :  { %v93_v50 = vmul.f32 %v85_v48, %v85_v48  ;;  %1582 = vmatpush3.bf16.msra.mxu0 %v1579_v4  ;;  %1639 = vmatprep.subr.bf16.mxu1 %v1842_v7 }
  0xa6   :  { %1584 = vmatprep.subr.bf16.mxu0 %v1583_v11 }
  0xa7   :  { %56 = vadd.xlane.f32.xlu1 %v1982_v47  ;;  %107 = vadd.xlane.f32.xlu0 %v93_v50 }
  0xa8   :  { %1277 = vmatmul.mubr.f32.vlgmr.msra.gmra.mrb[0].mxu1 %v1844_v25 }
  0xa9   :  { %1586 = vmatpush3.bf16.msra.mxu0 %v1583_v11  ;;  %1641 = vmatpush3.bf16.msra.mxu1 %v1924_v13 }
  0xaa   :  { %1588 = vmatprep.subr.bf16.mxu0 %v1587_v20  ;;  %1346 = vmatprep.mubr.msk.f32.mxu1 %vm1843_vm1, %v1844_v25 }
  0xab   :  { %1642 = vmatprep.subr.bf16.mxu1 %v1842_v7 }
  0xad   :  { %1590 = vmatpush3.bf16.msra.mxu0 %v1587_v20  ;;  %1644 = vmatpush3.bf16.msra.mxu1 %v1971_v44 }
  0xae   :  { %1615 = vmatprep.subr.bf16.mxu0 %v1842_v7  ;;  %1645 = vmatprep.subr.bf16.mxu1 %v1842_v7 }
  0xb1   :  { %1647 = vmatpush3.bf16.msra.mxu1 %v1996_v53 }
  0xb2   :  { %1648 = vmatprep.subr.bf16.mxu1 %v1842_v7 }
  0xb5   :  { %1650 = vmatpush3.bf16.msra.mxu1 %v2012_v59 }
  0xb6   :  { %1651 = vmatprep.subr.bf16.mxu1 %v1842_v7 }
  0xb9   :  { %1653 = vmatpush3.bf16.msra.mxu1 %v2028_v1 }
  0xba   :  { %1654 = vmatprep.subr.bf16.mxu1 %v1842_v7 }
  0xbd   :  { %1656 = vmatpush3.bf16.msra.mxu1 %v2044_v8 }
  0xbe   :  { %1657 = vmatprep.subr.bf16.mxu1 %v1842_v7 }
  0xc1   :  { %1659 = vmatpush3.bf16.msra.mxu1 %v2060_v15 }
  0xc2   :  { %1660 = vmatprep.subr.bf16.mxu1 %v1842_v7 }
  0xc5   :  { %1662 = vmatpush3.bf16.msra.mxu1 %v2076_v23 }
  0xc6   :  { %1687 = vmatprep.subr.bf16.mxu1 %v1842_v7 }
 0x124   :  { %v96_v26 = vpop.xlane.xlu1 %95 }
 0x125   :  { %v111_v27 = vmul.f32 0.03125, %v96_v26 }
 0x127   :  { %v119_v28 = vadd.f32 1e-05, %v111_v27 }
 0x128   :  { %v98_v30 = vpop.xlane.xlu1 %97 }
 0x129   :  { %1810 = vrsqrt.f32 %v119_v28  ;;  %v112_v32 = vmul.f32 0.03125, %v98_v30 }
 0x12b   :  { %v120_v33 = vadd.f32 1e-05, %v112_v32 }
 0x12c   :  { %v49_v34 = vpop.xlane.xlu1 %48  ;;  %v100_v36 = vpop.xlane.xlu0 %99 }
 0x12d   :  { %1812 = vrsqrt.f32 %v120_v33  ;;  %v61_v38 = vmul.f32 0.03125, %v49_v34  ;;  %v113_v39 = vmul.f32 0.03125, %v100_v36 }
 0x12f   :  { %v2103_v40 = vsub.f32 %v1946_v31, %v61_v38  ;;  %v121_v42 = vadd.f32 1e-05, %v113_v39 }
 0x130   :  { %v53_v43 = vpop.xlane.xlu1 %52  ;;  %v104_v5 = vpop.xlane.xlu0 %103 }
 0x131   :  { %v63_v45 = vmul.f32 0.03125, %v53_v43  ;;  %v82_v46 = vsel %vm76_vm0, %v2103_v40, 0.0  ;;  %1814 = vrsqrt.f32 %v121_v42  ;;  %v115_v6 = vmul.f32 0.03125, %v104_v5 }
 0x132   :  { %v90_v48 = vmul.f32 %v82_v46, %v82_v46 }
 0x133   :  { %v1811_v49 = vpop.eup %1810  ;;  %v2109_v50 = vsub.f32 %v1957_v37, %v63_v45  ;;  %v123_v10 = vadd.f32 1e-05, %v115_v6 }
 0x134   :  { %101 = vadd.xlane.f32.xlu1 %v90_v48  ;;  %v57_v31 = vpop.xlane.xlu1 %56  ;;  %v135_v52 = vmul.f32 %v1811_v49, %v1931_v19  ;;  %v108_v9 = vpop.xlane.xlu0 %107 }
 0x135   :  { %v65_v54 = vmul.f32 0.03125, %v57_v31  ;;  %v84_v55 = vsel %vm76_vm0, %v2109_v50, 0.0  ;;  %v117_v11 = vmul.f32 0.03125, %v108_v9  ;;  %1816 = vrsqrt.f32 %v123_v10 }
 0x136   :  { %v92_v37 = vmul.f32 %v84_v55, %v84_v55  ;;  %v150_v57 = vmul.f32 %v2114_v51, %v135_v52  ;;  %v2175_v55 = vld [vmem:[%s2354_s4] ss:$0 sm:$0xff] }
 0x137   :  { %v1813_v58 = vpop.eup %1812  ;;  %v2127_v60 = vsub.f32 %v1982_v47, %v65_v54  ;;  %v125_v12 = vadd.f32 1e-05, %v117_v11 }
 0x138   :  { %105 = vadd.xlane.f32.xlu1 %v92_v37  ;;  %v165_v19 = vadd.f32 %v2123_v56, %v150_v57  ;;  %v136_v61 = vmul.f32 %v1813_v58, %v1936_v24 }
 0x139   :  { %v86_v62 = vsel %vm76_vm0, %v2127_v60, 0.0  ;;  %1818 = vrsqrt.f32 %v125_v12 }
 0x13a   :  { %1232 = vmatprep.mubr.f32.mxu0 %v165_v19  ;;  %v94_v63 = vmul.f32 %v86_v62, %v86_v62  ;;  %v151_v0 = vmul.f32 %v2114_v51, %v136_v61 }
 0x13b   :  { %v1815_v2 = vpop.eup %1814 }
 0x13c   :  { %109 = vadd.xlane.f32.xlu1 %v94_v63  ;;  %v166_v3 = vadd.f32 %v2123_v56, %v151_v0  ;;  %v137_v47 = vmul.f32 %v1815_v2, %v1941_v29 }
 0x13e   :  { %1233 = vmatmul.mubr.f32.vlgmr.msra.gmra.mrb[0].mxu0 %v166_v3  ;;  %v152_v4 = vmul.f32 %v2114_v51, %v137_v47 }
 0x13f   :  { %1617 = vmatpush3.bf16.msra.mxu0 %v1924_v13  ;;  %v1817_v28 = vpop.eup %1816 }
 0x140   :  { %v167_v24 = vadd.f32 %v2123_v56, %v152_v4  ;;  %1618 = vmatprep.subr.bf16.mxu0 %v1842_v7  ;;  %v139_v32 = vmul.f32 %v1817_v28, %v1951_v35  ;;  %v924_v28 = vld [vmem:[%s2355_s6 + $0x18] sm:$0xff] }
 0x142   :  { %1235 = vmatprep.mubr.f32.mxu0 %v167_v24  ;;  %v154_v38 = vmul.f32 %v2114_v51, %v139_v32  ;;  %v926_v32 = vld [vmem:[%s2355_s6 + $0x28] sm:$0xff] }
 0x143   :  { %1620 = vmatpush3.bf16.msra.mxu0 %v1971_v44  ;;  %v1819_v33 = vpop.eup %1818 }
 0x144   :  { %1621 = vmatprep.subr.bf16.mxu0 %v1842_v7  ;;  %v141_v39 = vmul.f32 %v1819_v33, %v1962_v41  ;;  %v169_v48 = vadd.f32 %v2123_v56, %v154_v38 }
 0x146   :  { %v156_v49 = vmul.f32 %v2114_v51, %v141_v39  ;;  %v929_v39 = vld [vmem:[%s2355_s6 + $0x40] sm:$0xff] }
 0x147   :  { %1623 = vmatpush3.bf16.msra.mxu0 %v1996_v53 }
 0x148   :  { %1624 = vmatprep.subr.bf16.mxu0 %v1842_v7  ;;  %v171_v52 = vadd.f32 %v2123_v56, %v156_v49 }
 0x14b   :  { %1626 = vmatpush3.bf16.msra.mxu0 %v2012_v59 }
 0x14c   :  { %1627 = vmatprep.subr.bf16.mxu0 %v1842_v7 }
 0x14f   :  { %1629 = vmatpush3.bf16.msra.mxu0 %v2028_v1 }
 0x150   :  { %1630 = vmatprep.subr.bf16.mxu0 %v1842_v7 }
 0x153   :  { %1632 = vmatpush3.bf16.msra.mxu0 %v2044_v8 }
 0x154   :  { %1633 = vmatprep.subr.bf16.mxu0 %v1842_v7 }
 0x157   :  { %1635 = vmatpush3.bf16.msra.mxu0 %v2060_v15 }
 0x158   :  { %1636 = vmatprep.subr.bf16.mxu0 %v1842_v7 }
 0x15b   :  { %1638 = vmatpush3.bf16.msra.mxu0 %v2076_v23 }
 0x15c   :  { %1663 = vmatprep.subr.bf16.mxu0 %v1842_v7 }
 0x17b   :  { %v393_v16 = vpop.f32.mrb[0].mxu1 }
 0x17c   :  { %v1278_v29 = vpop.f32.mrb[1].mxu1 }
 0x1c1   :  { %v102_v14 = vpop.xlane.xlu1 %101 }
 0x1c2   :  { %v114_v17 = vmul.f32 0.03125, %v102_v14 }
 0x1c4   :  { %v122_v18 = vadd.f32 1e-05, %v114_v17 }
 0x1c5   :  { %v106_v20 = vpop.xlane.xlu1 %105 }
 0x1c6   :  { %1820 = vrsqrt.f32 %v122_v18  ;;  %v116_v21 = vmul.f32 0.03125, %v106_v20 }
 0x1c8   :  { %v124_v22 = vadd.f32 1e-05, %v116_v21 }
 0x1c9   :  { %v110_v26 = vpop.xlane.xlu1 %109 }
 0x1ca   :  { %1822 = vrsqrt.f32 %v124_v22  ;;  %v118_v27 = vmul.f32 0.03125, %v110_v26 }
 0x1cc   :  { %v126_v30 = vadd.f32 1e-05, %v118_v27 }
 0x1ce   :  { %1824 = vrsqrt.f32 %v126_v30 }
 0x1d0   :  { %v1821_v34 = vpop.eup %1820 }
 0x1d1   :  { %v138_v36 = vmul.f32 %v1821_v34, %v2103_v40  ;;  %v927_v34 = vld [vmem:[%s2355_s6 + $0x30] sm:$0xff] }
 0x1d3   :  { %v153_v42 = vmul.f32 %v2114_v51, %v138_v36  ;;  %v928_v36 = vld [vmem:[%s2355_s6 + $0x38] sm:$0xff] }
 0x1d4   :  { %v1823_v43 = vpop.eup %1822  ;;  %v1793_v38 = vpack.c.bf16 %v928_v36, %v927_v34 }
 0x1d5   :  { %v168_v45 = vadd.f32 %v2123_v56, %v153_v42  ;;  %v140_v46 = vmul.f32 %v1823_v43, %v2109_v50  ;;  %v930_v42 = vld [vmem:[%s2355_s6 + $0x48] sm:$0xff] }
 0x1d6   :  { %v1796_v43 = vpack.c.bf16 %v930_v42, %v929_v39 }
 0x1d7   :  { %1236 = vmatmul.mubr.f32.gmra.mrb[2].mxu0 %v168_v45  ;;  %v155_v35 = vmul.f32 %v2114_v51, %v140_v46 }
 0x1d8   :  { %v1825_v31 = vpop.eup %1824  ;;  %1238 = vmatprep.mubr.f32.mxu0 %v169_v48 }
 0x1d9   :  { %v170_v40 = vadd.f32 %v2123_v56, %v155_v35  ;;  %v142_v41 = vmul.f32 %v1825_v31, %v2127_v60  ;;  %v931_v31 = vld [vmem:[%s2355_s6 + $0x50] sm:$0xff] }
 0x1db   :  { %1239 = vmatmul.mubr.f32.gmra.mrb[4].mxu0 %v170_v40  ;;  %v157_v54 = vmul.f32 %v2114_v51, %v142_v41  ;;  %v932_v40 = vld [vmem:[%s2355_s6 + $0x58] sm:$0xff] }
 0x1dc   :  { %1241 = vmatprep.mubr.f32.mxu0 %v171_v52  ;;  %v1799_v41 = vpack.c.bf16 %v932_v40, %v931_v31  ;;  %v933_v52 = vld [vmem:[%s2355_s6 + $0x60] sm:$0xff] }
 0x1dd   :  { %v172_v50 = vadd.f32 %v2123_v56, %v157_v54  ;;  %v934_v54 = vld [vmem:[%s2355_s6 + $0x68] sm:$0xff] }
 0x1df   :  { %1242 = vmatmul.mubr.f32.gmra.mrb[6].mxu0 %v172_v50  ;;  %v1802_v50 = vpack.c.bf16 %v934_v54, %v933_v52 }
 0x1e0   :  { %1311 = vmatprep.mubr.msk.f32.mxu0 %vm1843_vm1, %v1844_v25 }
 0x211   :  { %v1234_v37 = vpop.f32.mrb[0].mxu0 }
 0x212   :  { %v262_v57 = vpop.f32.mrb[1].mxu0  ;;  %v268_v2 = vadd.f32 %v1234_v37, %v2175_v55  ;;  %v935_v37 = vld [vmem:[%s2355_s6 + $0x70] sm:$0xff] }
 0x213   :  { %v263_v58 = vadd.f32 %v2175_v55, %v262_v57  ;;  %v936_v57 = vld [vmem:[%s2355_s6 + $0x78] sm:$0xff] }
 0x215   :  { %v397_v60 = vadd.f32 %v393_v16, %v263_v58  ;;  %v1805_v58 = vpack.c.bf16 %v936_v57, %v935_v37 }
 0x217   :  { %1826 = vtanh.f32 %v397_v60 }
 0x221   :  { %v1827_v19 = vpop.eup %1826 }
 0x222   :  { %1312 = vmatmul.mubr.f32.vlgmr.msra.gmra.mrb[8].mxu0 %v1827_v19 }
 0x223   :  { %1665 = vmatpush3.bf16.msra.mxu0 %v1924_v13  ;;  %1381 = vmatprep.mubr.msk.f32.mxu0 %vm1843_vm1, %v1844_v25 }
 0x224   :  { %1666 = vmatprep.subr.bf16.mxu0 %v1842_v7 }
 0x227   :  { %1668 = vmatpush3.bf16.msra.mxu0 %v1971_v44 }
 0x228   :  { %1669 = vmatprep.subr.bf16.mxu0 %v1842_v7 }
 0x22b   :  { %1671 = vmatpush3.bf16.msra.mxu0 %v1996_v53 }
 0x22c   :  { %1672 = vmatprep.subr.bf16.mxu0 %v1842_v7 }
 0x22f   :  { %1674 = vmatpush3.bf16.msra.mxu0 %v2012_v59 }
 0x230   :  { %1675 = vmatprep.subr.bf16.mxu0 %v1842_v7 }
 0x233   :  { %1677 = vmatpush3.bf16.msra.mxu0 %v2028_v1 }
 0x234   :  { %1678 = vmatprep.subr.bf16.mxu0 %v1842_v7 }
 0x237   :  { %1680 = vmatpush3.bf16.msra.mxu0 %v2044_v8 }
 0x238   :  { %1681 = vmatprep.subr.bf16.mxu0 %v1842_v7 }
 0x23b   :  { %1683 = vmatpush3.bf16.msra.mxu0 %v2060_v15 }
 0x23c   :  { %1684 = vmatprep.subr.bf16.mxu0 %v1842_v7 }
 0x23f   :  { %1686 = vmatpush3.bf16.msra.mxu0 %v2076_v23 }
 0x240   :  { %1711 = vmatprep.subr.bf16.mxu0 %v1842_v7 }
 0x2aa   :  { %v1237_v51 = vpop.f32.mrb[2].mxu0 }
 0x2ab   :  { %v272_v56 = vpop.f32.mrb[3].mxu0  ;;  %v278_v10 = vadd.f32 %v1237_v51, %v2175_v55 }
 0x2ac   :  { %v273_v16 = vadd.f32 %v2175_v55, %v272_v56 }
 0x2ae   :  { %v2196_v61 = vpop.f32.mrb[4].mxu0 }
 0x2af   :  { %v2198_v62 = vpop.f32.mrb[5].mxu0 }
 0x2b0   :  { %v283_v18 = vadd.f32 %v2175_v55, %v2198_v62  ;;  %v1022_v62 = vld [vmem:[%s2356_s7] ss:$0 sm:$0xff] }
 0x2b2   :  { %v2200_v63 = vpop.f32.mrb[6].mxu0 }
 0x2b3   :  { %v2202_v0 = vpop.f32.mrb[7].mxu0  ;;  %v298_v60 = vadd.f32 %v2200_v63, %v2175_v55 }
 0x2b4   :  { %v293_v45 = vadd.f32 %v2175_v55, %v2202_v0 }
 0x2f5   :  { %v467_v3 = vpop.f32.mrb[8].mxu0 }
 0x2f6   :  { %v471_v47 = vadd.f32 %v467_v3, %v268_v2  ;;  %v1313_v4 = vpop.f32.mrb[9].mxu0 }
 0x2f8   :  { %1828 = vtanh.f32 %v471_v47 }
 0x302   :  { %v1829_v24 = vpop.eup %1828 }
 0x303   :  { %1347 = vmatmul.mubr.f32.vlgmr.msra.gmra.mrb[2].mxu1 %v1829_v24 }
 0x304   :  { %1689 = vmatpush3.bf16.msra.mxu1 %v1924_v13  ;;  %1416 = vmatprep.mubr.msk.f32.mxu1 %vm1843_vm1, %v1844_v25 }
 0x305   :  { %1690 = vmatprep.subr.bf16.mxu1 %v1842_v7 }
 0x308   :  { %1692 = vmatpush3.bf16.msra.mxu1 %v1971_v44 }
 0x309   :  { %1693 = vmatprep.subr.bf16.mxu1 %v1842_v7 }
 0x30c   :  { %1695 = vmatpush3.bf16.msra.mxu1 %v1996_v53 }
 0x30d   :  { %1696 = vmatprep.subr.bf16.mxu1 %v1842_v7 }
 0x310   :  { %1698 = vmatpush3.bf16.msra.mxu1 %v2012_v59 }
 0x311   :  { %1699 = vmatprep.subr.bf16.mxu1 %v1842_v7 }
 0x314   :  { %1701 = vmatpush3.bf16.msra.mxu1 %v2028_v1 }
 0x315   :  { %1702 = vmatprep.subr.bf16.mxu1 %v1842_v7 }
 0x318   :  { %1704 = vmatpush3.bf16.msra.mxu1 %v2044_v8 }
 0x319   :  { %1705 = vmatprep.subr.bf16.mxu1 %v1842_v7 }
 0x31c   :  { %1707 = vmatpush3.bf16.msra.mxu1 %v2060_v15 }
 0x31d   :  { %1708 = vmatprep.subr.bf16.mxu1 %v1842_v7 }
 0x320   :  { %1710 = vmatpush3.bf16.msra.mxu1 %v2076_v23 }
 0x321   :  { %1735 = vmatprep.subr.bf16.mxu1 %v1842_v7 }
 0x3d6   :  { %v541_v29 = vpop.f32.mrb[2].mxu1 }
 0x3d7   :  { %v545_v5 = vadd.f32 %v541_v29, %v273_v16  ;;  %v1348_v6 = vpop.f32.mrb[3].mxu1 }
 0x3d9   :  { %1830 = vtanh.f32 %v545_v5 }
 0x3e3   :  { %v1831_v9 = vpop.eup %1830 }
 0x3e4   :  { %1382 = vmatmul.mubr.f32.vlgmr.msra.gmra.mrb[10].mxu0 %v1831_v9 }
 0x3e5   :  { %1713 = vmatpush3.bf16.msra.mxu0 %v1924_v13  ;;  %1451 = vmatprep.mubr.msk.f32.mxu0 %vm1843_vm1, %v1844_v25 }
 0x3e6   :  { %1714 = vmatprep.subr.bf16.mxu0 %v1842_v7 }
 0x3e9   :  { %1716 = vmatpush3.bf16.msra.mxu0 %v1971_v44 }
 0x3ea   :  { %1717 = vmatprep.subr.bf16.mxu0 %v1842_v7 }
 0x3ed   :  { %1719 = vmatpush3.bf16.msra.mxu0 %v1996_v53 }
 0x3ee   :  { %1720 = vmatprep.subr.bf16.mxu0 %v1842_v7 }
 0x3f1   :  { %1722 = vmatpush3.bf16.msra.mxu0 %v2012_v59 }
 0x3f2   :  { %1723 = vmatprep.subr.bf16.mxu0 %v1842_v7 }
 0x3f5   :  { %1725 = vmatpush3.bf16.msra.mxu0 %v2028_v1 }
 0x3f6   :  { %1726 = vmatprep.subr.bf16.mxu0 %v1842_v7 }
 0x3f9   :  { %1728 = vmatpush3.bf16.msra.mxu0 %v2044_v8 }
 0x3fa   :  { %1729 = vmatprep.subr.bf16.mxu0 %v1842_v7 }
 0x3fd   :  { %1731 = vmatpush3.bf16.msra.mxu0 %v2060_v15 }
 0x3fe   :  { %1732 = vmatprep.subr.bf16.mxu0 %v1842_v7 }
 0x401   :  { %1734 = vmatpush3.bf16.msra.mxu0 %v2076_v23 }
 0x402   :  { %1759 = vmatprep.subr.bf16.mxu0 %v1842_v7 }
 0x4b7   :  { %v615_v11 = vpop.f32.mrb[10].mxu0 }
 0x4b8   :  { %v619_v12 = vadd.f32 %v615_v11, %v278_v10  ;;  %v1383_v14 = vpop.f32.mrb[11].mxu0 }
 0x4ba   :  { %1832 = vtanh.f32 %v619_v12 }
 0x4c4   :  { %v1833_v17 = vpop.eup %1832 }
 0x4c5   :  { %1417 = vmatmul.mubr.f32.vlgmr.msra.gmra.mrb[4].mxu1 %v1833_v17 }
 0x4c6   :  { %1737 = vmatpush3.bf16.msra.mxu1 %v1924_v13  ;;  %1486 = vmatprep.mubr.msk.f32.mxu1 %vm1843_vm1, %v1844_v25 }
 0x4c7   :  { %1738 = vmatprep.subr.bf16.mxu1 %v1842_v7 }
 0x4ca   :  { %1740 = vmatpush3.bf16.msra.mxu1 %v1971_v44 }
 0x4cb   :  { %1741 = vmatprep.subr.bf16.mxu1 %v1842_v7 }
 0x4ce   :  { %1743 = vmatpush3.bf16.msra.mxu1 %v1996_v53 }
 0x4cf   :  { %1744 = vmatprep.subr.bf16.mxu1 %v1842_v7 }
 0x4d2   :  { %1746 = vmatpush3.bf16.msra.mxu1 %v2012_v59 }
 0x4d3   :  { %1747 = vmatprep.subr.bf16.mxu1 %v1842_v7 }
 0x4d6   :  { %1749 = vmatpush3.bf16.msra.mxu1 %v2028_v1 }
 0x4d7   :  { %1750 = vmatprep.subr.bf16.mxu1 %v1842_v7 }
 0x4da   :  { %1752 = vmatpush3.bf16.msra.mxu1 %v2044_v8 }
 0x4db   :  { %1753 = vmatprep.subr.bf16.mxu1 %v1842_v7 }
 0x4de   :  { %1755 = vmatpush3.bf16.msra.mxu1 %v2060_v15 }
 0x4df   :  { %1756 = vmatprep.subr.bf16.mxu1 %v1842_v7 }
 0x4e2   :  { %1758 = vmatpush3.bf16.msra.mxu1 %v2076_v23 }
 0x4e3   :  { %1783 = vmatprep.subr.bf16.mxu1 %v1842_v7 }
 0x598   :  { %v689_v20 = vpop.f32.mrb[4].mxu1 }
 0x599   :  { %v693_v21 = vadd.f32 %v689_v20, %v283_v18  ;;  %v1418_v22 = vpop.f32.mrb[5].mxu1 }
 0x59b   :  { %1834 = vtanh.f32 %v693_v21 }
 0x5a5   :  { %v1835_v26 = vpop.eup %1834 }
 0x5a6   :  { %1452 = vmatmul.mubr.f32.vlgmr.msra.gmra.mrb[12].mxu0 %v1835_v26 }
 0x5a7   :  { %1761 = vmatpush3.bf16.msra.mxu0 %v1924_v13  ;;  %1521 = vmatprep.mubr.msk.f32.mxu0 %vm1843_vm1, %v1844_v25  ;;  %v288_v13 = vadd.f32 %v2196_v61, %v2175_v55 }
 0x5a8   :  { %1762 = vmatprep.subr.bf16.mxu0 %v1842_v7 }
 0x5ab   :  { %1764 = vmatpush3.bf16.msra.mxu0 %v1971_v44 }
 0x5ac   :  { %1765 = vmatprep.subr.bf16.mxu0 %v1842_v7 }
 0x5af   :  { %1767 = vmatpush3.bf16.msra.mxu0 %v1996_v53 }
 0x5b0   :  { %1768 = vmatprep.subr.bf16.mxu0 %v1842_v7 }
 0x5b3   :  { %1770 = vmatpush3.bf16.msra.mxu0 %v2012_v59 }
 0x5b4   :  { %1771 = vmatprep.subr.bf16.mxu0 %v1842_v7 }
 0x5b7   :  { %1773 = vmatpush3.bf16.msra.mxu0 %v2028_v1 }
 0x5b8   :  { %1774 = vmatprep.subr.bf16.mxu0 %v1842_v7 }
 0x5bb   :  { %1776 = vmatpush3.bf16.msra.mxu0 %v2044_v8  ;;  %v921_v8 = vld [vmem:[%s2355_s6] sm:$0xff] }
 0x5bc   :  { %1777 = vmatprep.subr.bf16.mxu0 %v1842_v7 }
 0x5bf   :  { %1779 = vmatpush3.bf16.msra.mxu0 %v2060_v15  ;;  %v922_v15 = vld [vmem:[%s2355_s6 + $0x8] sm:$0xff] }
 0x5c0   :  { %1780 = vmatprep.subr.bf16.mxu0 %v1842_v7  ;;  %v1784_v27 = vpack.c.bf16 %v922_v15, %v921_v8 }
 0x5c3   :  { %1782 = vmatpush3.bf16.msra.mxu0 %v2076_v23  ;;  %v923_v23 = vld [vmem:[%s2355_s6 + $0x10] sm:$0xff] }
 0x5c4   :  { %v1787_v30 = vpack.c.bf16 %v924_v28, %v923_v23 }
 0x679   :  { %v763_v44 = vpop.f32.mrb[12].mxu0 }
 0x67a   :  { %v767_v53 = vadd.f32 %v763_v44, %v288_v13  ;;  %v1453_v59 = vpop.f32.mrb[13].mxu0 }
 0x67c   :  { %1836 = vtanh.f32 %v767_v53 }
 0x686   :  { %v1837_v1 = vpop.eup %1836 }
 0x687   :  { %1487 = vmatmul.mubr.f32.vlgmr.msra.gmra.mrb[6].mxu1 %v1837_v1 }
 0x688   :  { %1556 = vmatprep.mubr.msk.f32.mxu1 %vm1843_vm1, %v1844_v25  ;;  %1785 = vmatpush3.bf16.msra.mxu1 %v1784_v27  ;;  %v925_v25 = vld [vmem:[%s2355_s6 + $0x20] sm:$0xff] }
 0x689   :  { %1786 = vmatprep.subr.bf16.mxu1 %v1842_v7  ;;  %v1790_v33 = vpack.c.bf16 %v926_v32, %v925_v25 }
 0x68c   :  { %1788 = vmatpush3.bf16.msra.mxu1 %v1787_v30 }
 0x68d   :  { %1789 = vmatprep.subr.bf16.mxu1 %v1842_v7 }
 0x690   :  { %1791 = vmatpush3.bf16.msra.mxu1 %v1790_v33 }
 0x691   :  { %1792 = vmatprep.subr.bf16.mxu1 %v1842_v7 }
 0x694   :  { %1794 = vmatpush3.bf16.msra.mxu1 %v1793_v38 }
 0x695   :  { %1795 = vmatprep.subr.bf16.mxu1 %v1842_v7 }
 0x698   :  { %1797 = vmatpush3.bf16.msra.mxu1 %v1796_v43 }
 0x699   :  { %1798 = vmatprep.subr.bf16.mxu1 %v1842_v7 }
 0x69c   :  { %1800 = vmatpush3.bf16.msra.mxu1 %v1799_v41 }
 0x69d   :  { %1801 = vmatprep.subr.bf16.mxu1 %v1842_v7 }
 0x6a0   :  { %1803 = vmatpush3.bf16.msra.mxu1 %v1802_v50 }
 0x6a1   :  { %1804 = vmatprep.subr.bf16.mxu1 %v1842_v7 }
 0x6a4   :  { %1806 = vmatpush3.bf16.msra.mxu1 %v1805_v58 }
 0x75a   :  { %v837_v46 = vpop.f32.mrb[6].mxu1 }
 0x75b   :  { %v841_v48 = vadd.f32 %v837_v46, %v293_v45  ;;  %v1488_v49 = vpop.f32.mrb[7].mxu1 }
 0x75d   :  { %1838 = vtanh.f32 %v841_v48 }
 0x767   :  { %v1839_v35 = vpop.eup %1838 }
 0x768   :  { %1522 = vmatmul.mubr.f32.vlgmr.msra.gmra.mrb[14].mxu0 %v1839_v35 }
 0x83b   :  { %v911_v19 = vpop.f32.mrb[14].mxu0 }
 0x83c   :  { %v915_v51 = vadd.f32 %v911_v19, %v298_v60  ;;  %v1523_v56 = vpop.f32.mrb[15].mxu0 }
 0x83e   :  { %1840 = vtanh.f32 %v915_v51 }
 0x848   :  { %v1841_v61 = vpop.eup %1840 }
 0x849   :  { %1557 = vmatmul.mubr.f32.vlgmr.msra.gmra.mrb[8].mxu1 %v1841_v61 }
 0x91c   :  { %v1010_v0 = vpop.f32.mrb[8].mxu1 }
 0x91d   :  { %v1011_v2 = vadd.f32 %v1022_v62, %v1010_v0  ;;  %v1558_v3 = vpop.f32.mrb[9].mxu1 }
 0x91f   :  { %1014 = vst [vmem:[%s2357_s8] sm:$0xff] %v1011_v2 }

</bundles_post_ra>
